<compile_context>
chip_gen: v5e
topology: v5e:2x2
jax: 0.10.0
libtpu: 0.0.40
codegen_flags: <defaults>
</compile_context>

<pallas_src>
import functools

import jax
import jax.numpy as jnp
from jax.experimental import pallas as pl
from jax.experimental.pallas import tpu as pltpu

ACTION_SCALE = 1.0   # action_space is None in this synthetic setup
ACTION_BIAS = 0.0

LANE = 128
SUBLANE = 8          # f32 sublane pack (param slab, noise block)
BPACK = 16           # bf16 sublane pack (streamed state / output tiles)
MAX_BATCH_TILE = 1024


def _round_up(x, m):
    return (x + m - 1) // m * m


def _layout(num_inputs, num_actions, hidden_dim):
    """Shared layout constants for the packed parameter slab and output block."""
    h_pad = _round_up(hidden_dim, LANE)
    half = 64 if num_actions <= 64 else _round_up(num_actions, LANE)
    out_cols = 2 * half                  # 128 when num_actions <= 64
    r2 = _round_up(num_inputs, SUBLANE)  # w2 block start row
    r3 = r2 + h_pad                      # mean-head block start row
    rb = r3 + h_pad                      # bias rows start (8-aligned)
    rows = rb + 3 * SUBLANE
    cols = max(h_pad, out_cols)
    return h_pad, half, out_cols, r2, r3, rb, rows, cols


# ---------------------------------------------------------------------------
# Kernel
# ---------------------------------------------------------------------------
def _policy_kernel(state_ref, params_ref, noise_ref, out_ref, *,
                   n_in, h_pad, out_cols, r2, r3, rb):
    """One batch tile: 3 matmuls + biases + relu + tanh + clamped-noise add.

    params_ref packs (row-wise, f32, lane-padded):
        rows [0      : n_in     )  w1  (n_in,  h_pad)
        rows [r2     : r2+h_pad )  w2  (h_pad, h_pad)
        rows [r3     : r3+h_pad )  wm  duplicated into cols [0:A) and [half:half+A)
        row   rb                   b1
        row   rb+8                 b2
        row   rb+16                bm  duplicated into both column halves
    """
    # Upcast streamed bf16 state to f32 immediately (v5e VPU/EUP have no bf16).
    x = state_ref[...].astype(jnp.float32)                      # (tb, n_in)

    # linear1 + relu
    w1 = params_ref[0:n_in, 0:h_pad]
    b1 = params_ref[rb:rb + 1, 0:h_pad]
    h1 = jnp.dot(x, w1, preferred_element_type=jnp.float32) + b1
    h1 = jnp.maximum(h1, 0.0)

    # linear2 + relu
    w2 = params_ref[r2:r2 + h_pad, 0:h_pad]
    b2 = params_ref[rb + SUBLANE:rb + SUBLANE + 1, 0:h_pad]
    h2 = jnp.dot(h1, w2, preferred_element_type=jnp.float32) + b2
    h2 = jnp.maximum(h2, 0.0)

    # mean head: weights/bias are duplicated in both column halves of the slab,
    # so one matmul yields mean in lanes [0:half) AND in lanes [half:out_cols).
    wm = params_ref[r3:r3 + h_pad, 0:out_cols]
    bm = params_ref[rb + 2 * SUBLANE:rb + 2 * SUBLANE + 1, 0:out_cols]
    m = jnp.dot(h2, wm, preferred_element_type=jnp.float32) + bm
    mean2 = jnp.tanh(m) * ACTION_SCALE + ACTION_BIAS            # (tb, out_cols)

    # noise lives only in lanes [0:num_actions) of row 0 (zeros elsewhere), so
    # adding it perturbs only the action half.  clamp(-0.25, 0.25) as in torch.
    noise = jnp.clip(noise_ref[0:1, 0:out_cols], -0.25, 0.25)   # (1, out_cols)

    # ONE lane-dense full-width store: [:, :half] = action, [:, half:] = mean.
    out_ref[...] = (mean2 + noise).astype(out_ref.dtype)


# ---------------------------------------------------------------------------
# Wrapper
# ---------------------------------------------------------------------------
def deterministic_policy_forward(state, packed_params, noise,
                                 num_inputs, num_actions, hidden_dim):
    """Returns (action, log_prob_placeholder, mean) like the torch module."""
    B = state.shape[0]
    h_pad, half, out_cols, r2, r3, rb, rows, cols = _layout(
        num_inputs, num_actions, hidden_dim)

    # Batch padded only to the bf16 sublane pack; tile chosen so the grid has
    # >= 2 steps whenever the batch allows it (v7x dual-TensorCore sharding).
    b_pad = _round_up(B, BPACK)
    tb = min(MAX_BATCH_TILE, max(BPACK, _round_up(-(-b_pad // 2), BPACK)))
    grid = pl.cdiv(b_pad, tb)            # partial last tile handled by Pallas

    # bf16 streamed state at its natural feature width (no 128-lane pre-pad).
    state_bf = state.astype(jnp.bfloat16)
    if b_pad != B:
        state_bf = jnp.pad(state_bf, ((0, b_pad - B), (0, 0)))

    # noise: tiny resident f32 block; real values in row 0, lanes [0:A) only.
    noise_p = jnp.zeros((SUBLANE, out_cols), jnp.float32)
    noise_p = noise_p.at[0, :num_actions].set(noise.astype(jnp.float32))

    kernel = functools.partial(_policy_kernel, n_in=num_inputs, h_pad=h_pad,
                               out_cols=out_cols, r2=r2, r3=r3, rb=rb)

    out = pl.pallas_call(
        kernel,
        out_shape=jax.ShapeDtypeStruct((b_pad, out_cols), jnp.bfloat16),
        grid_spec=pltpu.PrefetchScalarGridSpec(
            num_scalar_prefetch=0,
            grid=(grid,),
            in_specs=[
                # streamed bf16 batch tile (auto double-buffered)
                pl.BlockSpec((tb, num_inputs), lambda i: (i, 0)),
                # packed params: constant index_map -> stays VMEM-resident,
                # no re-DMA across grid steps
                pl.BlockSpec((rows, cols), lambda i: (0, 0)),
                # noise: tiny, resident
                pl.BlockSpec((SUBLANE, out_cols), lambda i: (0, 0)),
            ],
            out_specs=pl.BlockSpec((tb, out_cols), lambda i: (i, 0)),
        ),
        compiler_params=pltpu.CompilerParams(
            dimension_semantics=("parallel",)),  # shard batch tiles across TCs
    )(state_bf, packed_params, noise_p)

    out = out.astype(jnp.float32)
    action = out[:B, 0:num_actions]
    mean = out[:B, half:half + num_actions]
    return action, jnp.array(0.0, dtype=jnp.float32), mean


# ---------------------------------------------------------------------------
# Parameter init / packing (done ONCE, not per call)
# ---------------------------------------------------------------------------
def xavier_uniform(key, fan_in, fan_out):
    # torch.nn.init.xavier_uniform_ with gain=1; weight stored here as (in, out).
    # NOTE: real torch nn.Linear weights are (out, in) -> transpose before packing.
    bound = (6.0 / (fan_in + fan_out)) ** 0.5
    return jax.random.uniform(key, (fan_in, fan_out), jnp.float32, -bound, bound)


def init_params(key, num_inputs, num_actions, hidden_dim):
    k1, k2, k3 = jax.random.split(key, 3)
    w1 = xavier_uniform(k1, num_inputs, hidden_dim)
    w2 = xavier_uniform(k2, hidden_dim, hidden_dim)
    wm = xavier_uniform(k3, hidden_dim, num_actions)
    b1 = jnp.zeros((hidden_dim,), jnp.float32)
    b2 = jnp.zeros((hidden_dim,), jnp.float32)
    bm = jnp.zeros((num_actions,), jnp.float32)
    return (w1, b1, w2, b2, wm, bm)


def pack_params(params, num_inputs, num_actions, hidden_dim):
    """Zero-pad and pack all weights/biases into one lane-dense f32 slab.

    The mean head (wm, bm) is written into BOTH column halves so the kernel's
    single N=out_cols matmul produces the action half and the mean half at once.
    """
    w1, b1, w2, b2, wm, bm = params
    h_pad, half, out_cols, r2, r3, rb, rows, cols = _layout(
        num_inputs, num_actions, hidden_dim)

    slab = jnp.zeros((rows, cols), jnp.float32)
    slab = slab.at[0:num_inputs, 0:hidden_dim].set(w1)
    slab = slab.at[r2:r2 + hidden_dim, 0:hidden_dim].set(w2)
    slab = slab.at[r3:r3 + hidden_dim, 0:num_actions].set(wm)
    slab = slab.at[r3:r3 + hidden_dim, half:half + num_actions].set(wm)
    slab = slab.at[rb, 0:hidden_dim].set(b1)
    slab = slab.at[rb + SUBLANE, 0:hidden_dim].set(b2)
    slab = slab.at[rb + 2 * SUBLANE, 0:num_actions].set(bm)
    slab = slab.at[rb + 2 * SUBLANE, half:half + num_actions].set(bm)
    return slab


# ---------------------------------------------------------------------------
# Demo + self-check
# ---------------------------------------------------------------------------
if __name__ == "__main__":
    num_inputs, num_actions, hidden_dim = 32, 8, 32
    batch = 4

    key = jax.random.PRNGKey(0)
    k_params, k_state, k_noise = jax.random.split(key, 3)

    params = init_params(k_params, num_inputs, num_actions, hidden_dim)
    packed = pack_params(params, num_inputs, num_actions, hidden_dim)

    state = jax.random.normal(k_state, (batch, num_inputs), jnp.float32)
    # self.noise.normal_(0., std=0.1): one (num_actions,) vector per forward
    # call; sampled here in plain JAX, clamped inside the kernel.
    noise = 0.1 * jax.random.normal(k_noise, (num_actions,), jnp.float32)

    action, logp, mean = deterministic_policy_forward(
        state, packed, noise, num_inputs, num_actions, hidden_dim)
    jax.block_until_ready((action, logp, mean))

    assert action.shape == (batch, num_actions)
    assert mean.shape == (batch, num_actions)

    # pure-JAX f32 reference; tolerance sized for bf16 streamed I/O (~2^-9 rel).
    w1, b1, w2, b2, wm, bm = params
    hp = jnp.maximum(state @ w1 + b1, 0.0)
    hp = jnp.maximum(hp @ w2 + b2, 0.0)
    mean_ref = jnp.tanh(hp @ wm + bm) * ACTION_SCALE + ACTION_BIAS
    action_ref = mean_ref + jnp.clip(noise, -0.25, 0.25)
    assert jnp.allclose(mean, mean_ref, atol=2e-2, rtol=2e-2)
    assert jnp.allclose(action, action_ref, atol=2e-2, rtol=2e-2)

    print("KERNEL_OK")
</pallas_src>

<mosaic_0001>
module attributes {stable_mosaic.version = 11 : i64} {
  func.func @_policy_kernel(%arg0: i32, %arg1: memref<16x32xbf16, #tpu.memory_space<vmem>>, %arg2: memref<312x128xf32, #tpu.memory_space<vmem>>, %arg3: memref<8x128xf32, #tpu.memory_space<vmem>>, %arg4: memref<16x128xbf16, #tpu.memory_space<vmem>>) attributes {dimension_semantics = [#tpu.dimension_semantics<parallel>], iteration_bounds = array<i64: 1>, scalar_prefetch = 0 : i64, scratch_operands = 0 : i64, tpu.core_type = #tpu.core_type<tc>, window_params = [{transform_indices = @transform_0, window_bounds = array<i64: 16, 32>}, {pipeline_mode = #tpu.pipeline_mode<synchronous>, transform_indices = @transform_1, window_bounds = array<i64: 312, 128>}, {pipeline_mode = #tpu.pipeline_mode<synchronous>, transform_indices = @transform_2, window_bounds = array<i64: 8, 128>}, {transform_indices = @transform_3, window_bounds = array<i64: 16, 128>}]} {
    %c0 = arith.constant 0 : index
    %c0_0 = arith.constant 0 : index
    %0 = vector.load %arg1[%c0, %c0_0] : memref<16x32xbf16, #tpu.memory_space<vmem>>, vector<16x32xbf16>
    %1 = arith.extf %0 : vector<16x32xbf16> to vector<16x32xf32>
    %c0_1 = arith.constant 0 : index
    %c0_2 = arith.constant 0 : index
    %2 = vector.load %arg2[%c0_1, %c0_2] : memref<312x128xf32, #tpu.memory_space<vmem>>, vector<32x128xf32>
    %c288 = arith.constant 288 : index
    %c0_3 = arith.constant 0 : index
    %3 = vector.load %arg2[%c288, %c0_3] : memref<312x128xf32, #tpu.memory_space<vmem>>, vector<1x128xf32>
    %cst = arith.constant dense<0.000000e+00> : vector<16x128xf32>
    %4 = tpu.matmul %1, %2, %cst {dimension_numbers = #tpu.dot_dimension_numbers<[1], [0], [0], [1], [0, 0, 1, 1], [], []>} : vector<16x32xf32>, vector<32x128xf32>, vector<16x128xf32> -> vector<16x128xf32>
    %5 = vector.broadcast %3 : vector<1x128xf32> to vector<16x128xf32>
    %6 = arith.addf %4, %5 : vector<16x128xf32>
    %cst_4 = arith.constant 0.000000e+00 : f32
    %7 = vector.broadcast %cst_4 : f32 to vector<16x128xf32>
    %8 = arith.maximumf %6, %7 : vector<16x128xf32>
    %c32 = arith.constant 32 : index
    %c0_5 = arith.constant 0 : index
    %9 = vector.load %arg2[%c32, %c0_5] : memref<312x128xf32, #tpu.memory_space<vmem>>, vector<128x128xf32>
    %c296 = arith.constant 296 : index
    %c0_6 = arith.constant 0 : index
    %10 = vector.load %arg2[%c296, %c0_6] : memref<312x128xf32, #tpu.memory_space<vmem>>, vector<1x128xf32>
    %cst_7 = arith.constant dense<0.000000e+00> : vector<16x128xf32>
    %11 = tpu.matmul %8, %9, %cst_7 {dimension_numbers = #tpu.dot_dimension_numbers<[1], [0], [0], [1], [0, 0, 1, 1], [], []>} : vector<16x128xf32>, vector<128x128xf32>, vector<16x128xf32> -> vector<16x128xf32>
    %12 = vector.broadcast %10 : vector<1x128xf32> to vector<16x128xf32>
    %13 = arith.addf %11, %12 : vector<16x128xf32>
    %cst_8 = arith.constant 0.000000e+00 : f32
    %14 = vector.broadcast %cst_8 : f32 to vector<16x128xf32>
    %15 = arith.maximumf %13, %14 : vector<16x128xf32>
    %c160 = arith.constant 160 : index
    %c0_9 = arith.constant 0 : index
    %16 = vector.load %arg2[%c160, %c0_9] : memref<312x128xf32, #tpu.memory_space<vmem>>, vector<128x128xf32>
    %c304 = arith.constant 304 : index
    %c0_10 = arith.constant 0 : index
    %17 = vector.load %arg2[%c304, %c0_10] : memref<312x128xf32, #tpu.memory_space<vmem>>, vector<1x128xf32>
    %cst_11 = arith.constant dense<0.000000e+00> : vector<16x128xf32>
    %18 = tpu.matmul %15, %16, %cst_11 {dimension_numbers = #tpu.dot_dimension_numbers<[1], [0], [0], [1], [0, 0, 1, 1], [], []>} : vector<16x128xf32>, vector<128x128xf32>, vector<16x128xf32> -> vector<16x128xf32>
    %19 = vector.broadcast %17 : vector<1x128xf32> to vector<16x128xf32>
    %20 = arith.addf %18, %19 : vector<16x128xf32>
    %21 = math.tanh %20 : vector<16x128xf32>
    %cst_12 = arith.constant 1.000000e+00 : f32
    %22 = vector.broadcast %cst_12 : f32 to vector<16x128xf32>
    %23 = arith.mulf %21, %22 : vector<16x128xf32>
    %cst_13 = arith.constant 0.000000e+00 : f32
    %24 = vector.broadcast %cst_13 : f32 to vector<16x128xf32>
    %25 = arith.addf %23, %24 : vector<16x128xf32>
    %c0_14 = arith.constant 0 : index
    %c0_15 = arith.constant 0 : index
    %26 = vector.load %arg3[%c0_14, %c0_15] : memref<8x128xf32, #tpu.memory_space<vmem>>, vector<1x128xf32>
    %cst_16 = arith.constant -2.500000e-01 : f32
    %cst_17 = arith.constant 2.500000e-01 : f32
    %27 = vector.broadcast %cst_16 : f32 to vector<1x128xf32>
    %28 = arith.maximumf %27, %26 : vector<1x128xf32>
    %29 = vector.broadcast %cst_17 : f32 to vector<1x128xf32>
    %30 = arith.minimumf %29, %28 : vector<1x128xf32>
    %31 = vector.broadcast %30 : vector<1x128xf32> to vector<16x128xf32>
    %32 = arith.addf %25, %31 : vector<16x128xf32>
    %33 = arith.truncf %32 : vector<16x128xf32> to vector<16x128xbf16>
    %c0_18 = arith.constant 0 : index
    %c0_19 = arith.constant 0 : index
    %34 = vector.load %arg4[%c0_18, %c0_19] : memref<16x128xbf16, #tpu.memory_space<vmem>>, vector<16x128xbf16>
    tpu.vector_store %arg4[%c0_18, %c0_19], %33 {strides = array<i32>} : memref<16x128xbf16, #tpu.memory_space<vmem>>, vector<16x128xbf16>,
    return
  }
  func.func @transform_0(%arg0: i32) -> (i32, i32) {
    %c0_i32 = arith.constant 0 : i32
    %c0_i32_0 = arith.constant 0 : i32
    return %arg0, %c0_i32 : i32, i32
  }
  func.func @transform_1(%arg0: i32) -> (i32, i32) {
    %c0_i32 = arith.constant 0 : i32
    %c0_i32_0 = arith.constant 0 : i32
    %c0_i32_1 = arith.constant 0 : i32
    return %c0_i32, %c0_i32_0 : i32, i32
  }
  func.func @transform_2(%arg0: i32) -> (i32, i32) {
    %c0_i32 = arith.constant 0 : i32
    %c0_i32_0 = arith.constant 0 : i32
    %c0_i32_1 = arith.constant 0 : i32
    return %c0_i32, %c0_i32_0 : i32, i32
  }
  func.func @transform_3(%arg0: i32) -> (i32, i32) {
    %c0_i32 = arith.constant 0 : i32
    %c0_i32_0 = arith.constant 0 : i32
    return %arg0, %c0_i32 : i32, i32
  }
}

</mosaic_0001>

<bundles_post_ra>
// kernel: tpu_custom_call.1
= control target key start
LH: loop header
LB: loop body
LE: loop exit
PB: predicated region body
PF: predicated region fallthrough
CT: control target
= control target key end

     0   :  { %8 = vsyncpa [#allocation3], 0  ;;  %s413_s0 = inlined_call_operand.hbm [shape: bf16[16,32], index: 0, kind: input, shape index: {}]   ;;  %s414_s1 = inlined_call_operand.hbm [shape: f32[312,128], index: 1, kind: input, shape index: {}]   ;;  %s415_s2 = inlined_call_operand.hbm [shape: f32[8,128], index: 2, kind: input, shape index: {}]   ;;  %s416_s3 = inlined_call_operand.hbm [shape: bf16[16,128], index: 3, kind: output, shape index: {}]  }
   0x1   :  { %9 = vsyncpa [#allocation6], 0  ;;  %s28_s14 = sshll.u32 %s414_s1, 4  ;;  %s29_s14 = int_to_ptr.hbm [resolvable:$true] %s28_s14 }
   0x2   :  { %10 = vsyncpa [#allocation4], 0  ;;  %s365_s15 = smov [#allocation5]   ;;  %s15_s19 = sshll.u32 %s413_s0, 4  ;;  %s16_s19 = int_to_ptr.hbm [resolvable:$true] %s15_s19 }
   0x3   :  { %s30_s16 = sshll.u32 %s365_s15, 4  ;;  %s366_s20 = smov 128   ;;  %s31_s16 = int_to_ptr.vmem [resolvable:$true] %s30_s16 }
   0x4   :  { %s367_s21 = smov 8   ;;  %s368_s22 = smov [#allocation2]  }
   0x5   :  { %36 = dma.hbm_to_vmem [thread:$0]  %s29_s14, 4992, %s31_s16, [#allocation6], %s366_s20, %s366_s20, %s367_s21  }
   0x6   :  { %s17_s23 = sshll.u32 %s368_s22, 4  ;;  %s369_s24 = smov 64   ;;  %s18_s23 = int_to_ptr.vmem [resolvable:$true] %s17_s23 }
   0x7   :  { %s370_s25 = smov 4   ;;  %s42_s27 = sshll.u32 %s415_s2, 4  ;;  %s43_s27 = int_to_ptr.hbm [resolvable:$true] %s42_s27 }
   0x8   :  { %23 = dma.hbm_to_vmem [thread:$0]  %s16_s19, 128, %s18_s23, [#allocation3], %s369_s24, %s369_s24, %s370_s25  }
   0x9   :  { %s371_s28 = smov [#allocation7]  }
   0xa   :  { %s44_s0 = sshll.u32 %s371_s28, 4  ;;  %s45_s0 = int_to_ptr.vmem [resolvable:$true] %s44_s0 }
   0xb   :  { %47 = dma.hbm_to_vmem [thread:$0]  %s43_s27, 128, %s45_s0, [#allocation6]  }
   0xc   :  { %359 = dma.done.wait [#allocation3], 128  }
   0xd   :  { %360 = vsyncadd [#allocation3], 4294967168 }
   0xe   :  { %361 = dma.done.wait [#allocation6], 5120  }
   0xf   :  { %362 = vsyncadd [#allocation6], 4294962176  ;;  %v67_v0 = vld [vmem:[#allocation5 + $0x18] sm:$0xff]  ;;  %v66_v1 = vld [vmem:[#allocation5 + $0x10] sm:$0xff]  ;;  %vm70_vm0 = vcmask 261120   ;;  %s372_s2 = smov [#allocation8]  }
  0x10   :  { %89 = vmatpush.msra.mxu0 %v67_v0  ;;  %v224_v2 = vld [vmem:[#allocation2] sm:$0xff]   ;;  %v65_v4 = vld [vmem:[#allocation5 + $0x8] sm:$0xff]  ;;  %v116_v5 = vld [vmem:[#allocation5 + $0x90] sm:$0xff]  ;;  %s204_s29 = sshll.u32 %s372_s2, 4  ;;  %s206_s5 = sshll.u32 %s416_s3, 4  ;;  %s205_s29 = int_to_ptr.vmem [resolvable:$true] %s204_s29  ;;  %s207_s5 = int_to_ptr.hbm [resolvable:$true] %s206_s5 }
  0x11   :  { %v117_v3 = vld [vmem:[#allocation5 + $0x98] sm:$0xff]  ;;  %v115_v6 = vld [vmem:[#allocation5 + $0x88] sm:$0xff]  ;;  %v64_v7 = vld [vmem:[#allocation5] sm:$0xff]  ;;  %v225_v8 = vunpack.c.l.bf16 %v224_v2  ;;  %v226_v13 = vunpack.c.h.bf16 %v224_v2 }
  0x12   :  { %120 = vmatpush.msra.mxu1 %v117_v3  ;;  %232 = vmatpush.msra.mxu3 %v117_v3  ;;  %v114_v9 = vld [vmem:[#allocation5 + $0x80] sm:$0xff]  ;;  %v113_v10 = vld [vmem:[#allocation5 + $0x78] sm:$0xff]  ;;  %v112_v11 = vld [vmem:[#allocation5 + $0x70] sm:$0xff] }
  0x13   :  { %90 = vmatpush.msra.mxu0 %v66_v1  ;;  %v111_v12 = vld [vmem:[#allocation5 + $0x68] sm:$0xff]  ;;  %v110_v14 = vld [vmem:[#allocation5 + $0x60] sm:$0xff]  ;;  %v109_v15 = vld [vmem:[#allocation5 + $0x58] sm:$0xff] }
  0x14   :  { %121 = vmatpush.msra.mxu1 %v116_v5  ;;  %233 = vmatpush.msra.mxu3 %v116_v5  ;;  %v108_v16 = vld [vmem:[#allocation5 + $0x50] sm:$0xff]  ;;  %v107_v17 = vld [vmem:[#allocation5 + $0x48] sm:$0xff]  ;;  %v106_v18 = vld [vmem:[#allocation5 + $0x40] sm:$0xff] }
  0x15   :  { %91 = vmatpush.msra.mxu0 %v65_v4  ;;  %v105_v19 = vld [vmem:[#allocation5 + $0x38] sm:$0xff]  ;;  %v104_v20 = vld [vmem:[#allocation5 + $0x30] sm:$0xff]  ;;  %v103_v21 = vld [vmem:[#allocation5 + $0x28] sm:$0xff] }
  0x16   :  { %122 = vmatpush.msra.mxu1 %v115_v6  ;;  %234 = vmatpush.msra.mxu3 %v115_v6  ;;  %v102_v22 = vld [vmem:[#allocation5 + $0x20] sm:$0xff]  ;;  %v160_v23 = vld [vmem:[#allocation5 + $0x118] sm:$0xff]  ;;  %v159_v24 = vld [vmem:[#allocation5 + $0x110] sm:$0xff] }
  0x17   :  { %92 = vmatpush.msra.mxu0 %v64_v7  ;;  %163 = vmatpush.msra.mxu2 %v160_v23  ;;  %v158_v25 = vld [vmem:[#allocation5 + $0x108] sm:$0xff]  ;;  %v157_v26 = vld [vmem:[#allocation5 + $0x100] sm:$0xff]  ;;  %v156_v27 = vld [vmem:[#allocation5 + $0xf8] sm:$0xff] }
  0x18   :  { %220 = vmatmul.msk.f32.vlgmr.msra.gmra.mxu0 %vm70_vm0, %v225_v8  ;;  %123 = vmatpush.msra.mxu1 %v114_v9  ;;  %v155_v28 = vld [vmem:[#allocation5 + $0xf0] sm:$0xff]  ;;  %v154_v29 = vld [vmem:[#allocation5 + $0xe8] sm:$0xff]  ;;  %v153_v30 = vld [vmem:[#allocation5 + $0xe0] sm:$0xff] }
  0x19   :  { %235 = vmatpush.msra.mxu3 %v114_v9  ;;  %164 = vmatpush.msra.mxu2 %v159_v24  ;;  %v152_v31 = vld [vmem:[#allocation5 + $0xd8] sm:$0xff]  ;;  %v256_v32 = vld [vmem:[#allocation5 + $0x120] ss:$0 sm:$0xff]  ;;  %v151_v33 = vld [vmem:[#allocation5 + $0xd0] sm:$0xff] }
  0x1a   :  { %124 = vmatpush.msra.mxu1 %v113_v10  ;;  %v150_v34 = vld [vmem:[#allocation5 + $0xc8] sm:$0xff]  ;;  %v149_v37 = vld [vmem:[#allocation5 + $0xc0] sm:$0xff]  ;;  %v148_v39 = vld [vmem:[#allocation5 + $0xb8] sm:$0xff] }
  0x1b   :  { %236 = vmatpush.msra.mxu3 %v113_v10  ;;  %165 = vmatpush.msra.mxu2 %v158_v25  ;;  %v147_v43 = vld [vmem:[#allocation5 + $0xb0] sm:$0xff]  ;;  %v146_v44 = vld [vmem:[#allocation5 + $0xa8] sm:$0xff]  ;;  %v145_v45 = vld [vmem:[#allocation5 + $0xa0] sm:$0xff] }
  0x1c   :  { %125 = vmatpush.msra.mxu1 %v112_v11  ;;  %v257_v46 = vld [vmem:[#allocation5 + $0x128] ss:$0 sm:$0xff]  ;;  %v258_v54 = vld [vmem:[#allocation5 + $0x130] ss:$0 sm:$0xff]  ;;  %v190_v56 = vld [vmem:[#allocation7] sm:$0x1] }
  0x1d   :  { %237 = vmatpush.msra.mxu3 %v112_v11  ;;  %166 = vmatpush.msra.mxu2 %v157_v26  ;;  %v222_v59 = vclamps-f32 %v190_v56, 0.25 }
  0x1e   :  { %126 = vmatpush.msra.mxu1 %v111_v12 }
  0x1f   :  { %238 = vmatpush.msra.mxu3 %v111_v12  ;;  %167 = vmatpush.msra.mxu2 %v156_v27  ;;  %v193_v60 = vperm.slane %v222_v59, 0 }
  0x20   :  { %221 = vmatmul.msk.f32.gmra.mxu0 %vm70_vm0, %v226_v13  ;;  %127 = vmatpush.msra.mxu1 %v110_v14 }
  0x21   :  { %239 = vmatpush.msra.mxu3 %v110_v14  ;;  %168 = vmatpush.msra.mxu2 %v155_v28 }
  0x22   :  { %128 = vmatpush.msra.mxu1 %v109_v15 }
  0x23   :  { %240 = vmatpush.msra.mxu3 %v109_v15  ;;  %169 = vmatpush.msra.mxu2 %v154_v29 }
  0x24   :  { %129 = vmatpush.msra.mxu1 %v108_v16 }
  0x25   :  { %241 = vmatpush.msra.mxu3 %v108_v16  ;;  %170 = vmatpush.msra.mxu2 %v153_v30 }
  0x26   :  { %130 = vmatpush.msra.mxu1 %v107_v17 }
  0x27   :  { %242 = vmatpush.msra.mxu3 %v107_v17  ;;  %171 = vmatpush.msra.mxu2 %v152_v31 }
  0x28   :  { %131 = vmatpush.msra.mxu1 %v106_v18 }
  0x29   :  { %243 = vmatpush.msra.mxu3 %v106_v18  ;;  %172 = vmatpush.msra.mxu2 %v151_v33 }
  0x2a   :  { %132 = vmatpush.msra.mxu1 %v105_v19 }
  0x2b   :  { %244 = vmatpush.msra.mxu3 %v105_v19  ;;  %173 = vmatpush.msra.mxu2 %v150_v34 }
  0x2c   :  { %133 = vmatpush.msra.mxu1 %v104_v20 }
  0x2d   :  { %245 = vmatpush.msra.mxu3 %v104_v20  ;;  %174 = vmatpush.msra.mxu2 %v149_v37 }
  0x2e   :  { %134 = vmatpush.msra.mxu1 %v103_v21 }
  0x2f   :  { %246 = vmatpush.msra.mxu3 %v103_v21  ;;  %175 = vmatpush.msra.mxu2 %v148_v39 }
  0x30   :  { %135 = vmatpush.msra.mxu1 %v102_v22 }
  0x31   :  { %247 = vmatpush.msra.mxu3 %v102_v22  ;;  %176 = vmatpush.msra.mxu2 %v147_v43 }
  0x33   :  { %177 = vmatpush.msra.mxu2 %v146_v44 }
  0x35   :  { %178 = vmatpush.msra.mxu2 %v145_v45 }
  0x95   :  { %v94_v35 = vpop.f32.mrf.mxu0 }
  0x96   :  { %v95_v36 = vadd.f32 %v256_v32, %v94_v35 }
  0x98   :  { %v100_v38 = vmax.f32 %v95_v36, 0.0 }
  0x9a   :  { %136 = vmatmul.f32.vlgmr.msra.gmra.mxu1 %v100_v38 }
  0x9d   :  { %v97_v40 = vpop.f32.mrf.mxu0 }
  0x9e   :  { %v98_v41 = vadd.f32 %v256_v32, %v97_v40 }
  0xa0   :  { %v101_v42 = vmax.f32 %v98_v41, 0.0 }
  0xa2   :  { %139 = vmatmul.f32.vlgmr.msra.gmra.mxu3 %v101_v42 }
 0x117   :  { %v137_v47 = vpop.f32.mrf.mxu1 }
 0x118   :  { %v138_v48 = vadd.f32 %v257_v46, %v137_v47 }
 0x11a   :  { %v143_v49 = vmax.f32 %v138_v48, 0.0 }
 0x11c   :  { %179 = vmatmul.f32.vlgmr.msra.gmra.mxu2 %v143_v49 }
 0x125   :  { %v140_v50 = vpop.f32.mrf.mxu3 }
 0x126   :  { %v141_v51 = vadd.f32 %v257_v46, %v140_v50 }
 0x128   :  { %v144_v52 = vmax.f32 %v141_v51, 0.0 }
 0x12a   :  { %182 = vmatmul.f32.gmra.mxu2 %v144_v52 }
 0x19f   :  { %v180_v53 = vpop.f32.mrf.mxu2 }
 0x1a0   :  { %v181_v55 = vadd.f32 %v258_v54, %v180_v53 }
 0x1a2   :  { %259 = vtanh.f32 %v181_v55 }
 0x1a8   :  { %v260_v61 = vpop.eup %259 }
 0x1a9   :  { %v194_v63 = vadd.f32 %v260_v61, %v193_v60 }
 0x1ad   :  { %v183_v57 = vpop.f32.mrf.mxu2 }
 0x1ae   :  { %v184_v58 = vadd.f32 %v258_v54, %v183_v57 }
 0x1b0   :  { %261 = vtanh.f32 %v184_v58 }
 0x1b6   :  { %v262_v62 = vpop.eup %261 }
 0x1b7   :  { %v195_v0 = vadd.f32 %v262_v62, %v193_v60 }
 0x1b9   :  { %v230_v1 = vpack.c.bf16 %v195_v0, %v194_v63 }
 0x1bb   :  { %231 = vst [vmem:[#allocation8] sm:$0xff] %v230_v1  }
 0x1bc   :  { %212 = dma.vmem_to_hbm [thread:$0]  %s205_s29, 128, %s207_s5, [#allocation4], %s369_s24, %s369_s24, %s370_s25  }
 0x1bd   :  { %363 = dma.done.wait [#allocation4], 128  }
 0x1be   :  { %364 = vsyncadd [#allocation4], 4294967168 }
 0x1bf   :  { %217 = vsyncpa [#allocation3], 1 }
 0x1c0   :  { %218 = vsyncpa [#allocation6], 1 }
 0x1c1   :  { %219 = vsyncpa [#allocation4], 1 }

</bundles_post_ra>
